<compile_context>
chip_gen: v6e
topology: v6e:2x2x1
jax: 0.10.0
libtpu: 0.0.40
codegen_flags: <defaults>
</compile_context>

<pallas_src>
import math

import jax
import jax.numpy as jnp
from jax.experimental import pallas as pl
from jax.experimental.pallas import tpu as pltpu


def _round_up(x: int, m: int) -> int:
    return (x + m - 1) // m * m


# ---------------------------------------------------------------------------
# Pallas kernel: n fused KV projections, one (TM, K_i) @ (K_i, Np_i) per proj.
# Ref order (positional): emb_0..emb_{n-1}, w_0..w_{n-1}, out_0..out_{n-1}.
# ---------------------------------------------------------------------------
def _make_kv_kernel(n_proj: int):
    def kernel(*refs):
        embs = refs[:n_proj]
        ws = refs[n_proj:2 * n_proj]
        outs = refs[2 * n_proj:]
        for emb_ref, w_ref, out_ref in zip(embs, ws, outs):
            acc = jnp.dot(emb_ref[...], w_ref[...],
                          preferred_element_type=jnp.float32)
            out_ref[...] = acc.astype(out_ref.dtype)
    return kernel


def fused_kv_projection(embs, weights, *, tm=256, compute_dtype=None):
    """Fused batched KV projections on the MXU.

    embs:    list of (B, N_i, D_i) embeddings
    weights: list of (D_i, E_i) projection weights (E_i = 3*D_i for AM decoder)
    Returns: list of (B, N_i, E_i) arrays; a single pallas_call for all of them.
    """
    n = len(embs)
    assert n >= 1 and n == len(weights)

    out_dtypes = [e.dtype for e in embs]
    cdt = compute_dtype if compute_dtype is not None else embs[0].dtype

    batch_shapes = [e.shape[:-1] for e in embs]          # (B, N_i)
    flat_ms = [math.prod(s) for s in batch_shapes]       # B*N_i
    ks = [e.shape[-1] for e in embs]                      # D_i
    ns = [w.shape[-1] for w in weights]                   # E_i

    # Flatten batch into the matmul M dim; pad all projections to a common Mp
    # so one grid over M tiles covers every projection.  M tiles are sublane
    # (8) aligned; tm never exceeds the padded extent.
    m_max = max(flat_ms)
    tm = min(tm, _round_up(m_max, 8))
    mp = _round_up(m_max, tm)

    embs_flat = [
        jnp.pad(e.reshape(m, k).astype(cdt), ((0, mp - m), (0, 0)))
        for e, m, k in zip(embs, flat_ms, ks)
    ]

    # Lane-dense outputs: pad output dim to a multiple of 128 (unmasked vst).
    nps = [_round_up(nd, 128) for nd in ns]
    ws_pad = [
        jnp.pad(w.astype(cdt), ((0, 0), (0, npad - nd)))
        for w, nd, npad in zip(weights, ns, nps)
    ]

    grid = (mp // tm,)

    in_specs = (
        [pl.BlockSpec((tm, k), lambda m: (m, 0)) for k in ks]
        + [pl.BlockSpec((k, npad), lambda m: (0, 0))   # constant -> weight resident
           for k, npad in zip(ks, nps)]
    )
    out_specs = tuple(
        pl.BlockSpec((tm, npad), lambda m: (m, 0)) for npad in nps
    )
    out_shape = tuple(
        jax.ShapeDtypeStruct((mp, npad), dt) for npad, dt in zip(nps, out_dtypes)
    )

    outs = pl.pallas_call(
        _make_kv_kernel(n),
        out_shape=out_shape,
        grid=grid,
        in_specs=in_specs,
        out_specs=out_specs,
        compiler_params=pltpu.CompilerParams(
            dimension_semantics=("parallel",)),   # v7x: split M tiles across TCs
    )(*embs_flat, *ws_pad)

    if not isinstance(outs, (tuple, list)):
        outs = (outs,)

    results = []
    for o, m, nd, bshape in zip(outs, flat_ms, ns, batch_shapes):
        results.append(o[:m, :nd].reshape(*bshape, nd))
    return results


# ---------------------------------------------------------------------------
# Python mirror of the BaseDecoder class
# ---------------------------------------------------------------------------
class SubDecoderKV:
    """Minimal stand-in for shelf/item sub-decoders: holds the KV weight and
    caches projected keys/values (what `_compute_kv` does in subclasses)."""

    def __init__(self, w_kv: jax.Array):
        self.w_kv = w_kv
        self.cached_kv = None

    def _compute_kv(self, emb: jax.Array) -> jax.Array:
        (self.cached_kv,) = fused_kv_projection([emb], [self.w_kv])
        return self.cached_kv


class BaseDecoder:
    def __init__(self, model_params=None):
        self.model_params = model_params
        self.generator = None
        self.shelf_decoder = None
        self.item_decoder = None
        self.training = False

    def forward(self, *args, **kwargs):
        # Abstract in the reference module as well.
        raise NotImplementedError("Implement item pointer in subclass!")

    def _compute_kv(self, shelf_emb, item_emb=None):
        has_shelf = hasattr(self.shelf_decoder, "_compute_kv")
        has_item = item_emb is not None and hasattr(self.item_decoder, "_compute_kv")
        if has_shelf and has_item:
            # Fuse both projections into a single pallas_call (one launch).
            kv_shelf, kv_item = fused_kv_projection(
                [shelf_emb, item_emb],
                [self.shelf_decoder.w_kv, self.item_decoder.w_kv],
            )
            self.shelf_decoder.cached_kv = kv_shelf
            self.item_decoder.cached_kv = kv_item
        elif has_shelf:
            self.shelf_decoder._compute_kv(shelf_emb)
        elif has_item:
            self.item_decoder._compute_kv(item_emb)

    def post_generator_hook(self, selected, state, key, **kwargs):
        return (selected, state)

    def setup(self, state):
        # TODO(synk): generator.reset / setup_state is host-side RL plumbing
        # (no tensor math); not representable as a Pallas kernel.
        assert self.generator is not None, "ensure generator is setup using set_decode_type"
        return state


# ---------------------------------------------------------------------------
# Demo / correctness check
# ---------------------------------------------------------------------------
if __name__ == "__main__":
    B, N_SHELF, N_ITEM, D = 2, 8, 10, 32

    key = jax.random.PRNGKey(0)
    k1, k2, k3, k4 = jax.random.split(key, 4)

    shelf_emb = jax.random.normal(k1, (B, N_SHELF, D), dtype=jnp.float32)
    item_emb = jax.random.normal(k2, (B, N_ITEM, D), dtype=jnp.float32)
    w_shelf = jax.random.normal(k3, (D, 3 * D), dtype=jnp.float32) * 0.05
    w_item = jax.random.normal(k4, (D, 3 * D), dtype=jnp.float32) * 0.05

    dec = BaseDecoder()
    dec.shelf_decoder = SubDecoderKV(w_shelf)
    dec.item_decoder = SubDecoderKV(w_item)

    # fused (shelf + item) path: single pallas_call
    dec._compute_kv(shelf_emb, item_emb)
    kv_shelf = jax.block_until_ready(dec.shelf_decoder.cached_kv)
    kv_item = jax.block_until_ready(dec.item_decoder.cached_kv)

    ref_shelf = jnp.einsum("bnd,de->bne", shelf_emb, w_shelf)
    ref_item = jnp.einsum("bnd,de->bne", item_emb, w_item)
    assert kv_shelf.shape == (B, N_SHELF, 3 * D)
    assert kv_item.shape == (B, N_ITEM, 3 * D)
    assert jnp.allclose(kv_shelf, ref_shelf, atol=1e-5, rtol=1e-5)
    assert jnp.allclose(kv_item, ref_item, atol=1e-5, rtol=1e-5)

    # shelf-only path (item_emb=None) exercises the n=1 projection
    dec2 = BaseDecoder()
    dec2.shelf_decoder = SubDecoderKV(w_shelf)
    dec2.item_decoder = SubDecoderKV(w_item)
    dec2._compute_kv(shelf_emb)
    kv_shelf_only = jax.block_until_ready(dec2.shelf_decoder.cached_kv)
    assert jnp.allclose(kv_shelf_only, ref_shelf, atol=1e-5, rtol=1e-5)

    # abstract forward must raise, like the reference module
    try:
        dec.forward()
        raise AssertionError("forward() should have raised NotImplementedError")
    except NotImplementedError:
        pass

    print("KERNEL_OK")
</pallas_src>

<mosaic_0001>
module attributes {stable_mosaic.version = 11 : i64} {
  func.func @kernel(%arg0: i32, %arg1: memref<24x32xf32, #tpu.memory_space<vmem>>, %arg2: memref<24x32xf32, #tpu.memory_space<vmem>>, %arg3: memref<32x128xf32, #tpu.memory_space<vmem>>, %arg4: memref<32x128xf32, #tpu.memory_space<vmem>>, %arg5: memref<24x128xf32, #tpu.memory_space<vmem>>, %arg6: memref<24x128xf32, #tpu.memory_space<vmem>>) attributes {dimension_semantics = [#tpu.dimension_semantics<parallel>], iteration_bounds = array<i64: 1>, scalar_prefetch = 0 : i64, scratch_operands = 0 : i64, tpu.core_type = #tpu.core_type<tc>, window_params = [{transform_indices = @transform_0, window_bounds = array<i64: 24, 32>}, {transform_indices = @transform_1, window_bounds = array<i64: 24, 32>}, {pipeline_mode = #tpu.pipeline_mode<synchronous>, transform_indices = @transform_2, window_bounds = array<i64: 32, 128>}, {pipeline_mode = #tpu.pipeline_mode<synchronous>, transform_indices = @transform_3, window_bounds = array<i64: 32, 128>}, {transform_indices = @transform_4, window_bounds = array<i64: 24, 128>}, {transform_indices = @transform_5, window_bounds = array<i64: 24, 128>}]} {
    %c0 = arith.constant 0 : index
    %c0_0 = arith.constant 0 : index
    %0 = vector.load %arg1[%c0, %c0_0] : memref<24x32xf32, #tpu.memory_space<vmem>>, vector<24x32xf32>
    %c0_1 = arith.constant 0 : index
    %c0_2 = arith.constant 0 : index
    %1 = vector.load %arg3[%c0_1, %c0_2] : memref<32x128xf32, #tpu.memory_space<vmem>>, vector<32x128xf32>
    %cst = arith.constant dense<0.000000e+00> : vector<24x128xf32>
    %2 = tpu.matmul %0, %1, %cst {dimension_numbers = #tpu.dot_dimension_numbers<[1], [0], [0], [1], [0, 0, 1, 1], [], []>} : vector<24x32xf32>, vector<32x128xf32>, vector<24x128xf32> -> vector<24x128xf32>
    %c0_3 = arith.constant 0 : index
    %c0_4 = arith.constant 0 : index
    %3 = vector.load %arg5[%c0_3, %c0_4] : memref<24x128xf32, #tpu.memory_space<vmem>>, vector<24x128xf32>
    tpu.vector_store %arg5[%c0_3, %c0_4], %2 {strides = array<i32>} : memref<24x128xf32, #tpu.memory_space<vmem>>, vector<24x128xf32>,
    %c0_5 = arith.constant 0 : index
    %c0_6 = arith.constant 0 : index
    %4 = vector.load %arg2[%c0_5, %c0_6] : memref<24x32xf32, #tpu.memory_space<vmem>>, vector<24x32xf32>
    %c0_7 = arith.constant 0 : index
    %c0_8 = arith.constant 0 : index
    %5 = vector.load %arg4[%c0_7, %c0_8] : memref<32x128xf32, #tpu.memory_space<vmem>>, vector<32x128xf32>
    %cst_9 = arith.constant dense<0.000000e+00> : vector<24x128xf32>
    %6 = tpu.matmul %4, %5, %cst_9 {dimension_numbers = #tpu.dot_dimension_numbers<[1], [0], [0], [1], [0, 0, 1, 1], [], []>} : vector<24x32xf32>, vector<32x128xf32>, vector<24x128xf32> -> vector<24x128xf32>
    %c0_10 = arith.constant 0 : index
    %c0_11 = arith.constant 0 : index
    %7 = vector.load %arg6[%c0_10, %c0_11] : memref<24x128xf32, #tpu.memory_space<vmem>>, vector<24x128xf32>
    tpu.vector_store %arg6[%c0_10, %c0_11], %6 {strides = array<i32>} : memref<24x128xf32, #tpu.memory_space<vmem>>, vector<24x128xf32>,
    return
  }
  func.func @transform_0(%arg0: i32) -> (i32, i32) {
    %c0_i32 = arith.constant 0 : i32
    %c0_i32_0 = arith.constant 0 : i32
    return %arg0, %c0_i32 : i32, i32
  }
  func.func @transform_1(%arg0: i32) -> (i32, i32) {
    %c0_i32 = arith.constant 0 : i32
    %c0_i32_0 = arith.constant 0 : i32
    return %arg0, %c0_i32 : i32, i32
  }
  func.func @transform_2(%arg0: i32) -> (i32, i32) {
    %c0_i32 = arith.constant 0 : i32
    %c0_i32_0 = arith.constant 0 : i32
    %c0_i32_1 = arith.constant 0 : i32
    return %c0_i32, %c0_i32_0 : i32, i32
  }
  func.func @transform_3(%arg0: i32) -> (i32, i32) {
    %c0_i32 = arith.constant 0 : i32
    %c0_i32_0 = arith.constant 0 : i32
    %c0_i32_1 = arith.constant 0 : i32
    return %c0_i32, %c0_i32_0 : i32, i32
  }
  func.func @transform_4(%arg0: i32) -> (i32, i32) {
    %c0_i32 = arith.constant 0 : i32
    %c0_i32_0 = arith.constant 0 : i32
    return %arg0, %c0_i32 : i32, i32
  }
  func.func @transform_5(%arg0: i32) -> (i32, i32) {
    %c0_i32 = arith.constant 0 : i32
    %c0_i32_0 = arith.constant 0 : i32
    return %arg0, %c0_i32 : i32, i32
  }
}

</mosaic_0001>

<bundles_post_ra>
// kernel: tpu_custom_call.1
= control target key start
LH: loop header
LB: loop body
LE: loop exit
PB: predicated region body
PF: predicated region fallthrough
CT: control target
= control target key end

     0   :  { %11 = vsyncpa [#allocation3], 0  ;;  %s592_s0 = inlined_call_operand.hbm [shape: f32[24,32], index: 0, kind: input, shape index: {}]   ;;  %s593_s1 = inlined_call_operand.hbm [shape: f32[24,32], index: 1, kind: input, shape index: {}]   ;;  %s594_s2 = inlined_call_operand.hbm [shape: f32[32,128], index: 2, kind: input, shape index: {}]   ;;  %s595_s3 = inlined_call_operand.hbm [shape: f32[32,128], index: 3, kind: input, shape index: {}]   ;;  %s596_s4 = inlined_call_operand.hbm [shape: f32[24,128], index: 4, kind: output, shape index: {0}]   ;;  %s597_s5 = inlined_call_operand.hbm [shape: f32[24,128], index: 5, kind: output, shape index: {1}]  }
   0x1   :  { %12 = vsyncpa [#allocation6], 0 }
   0x2   :  { %13 = vsyncpa [#allocation9], 0 }
   0x3   :  { %14 = vsyncpa [#allocation4], 0 }
   0x4   :  { %15 = vsyncpa [#allocation12], 0  ;;  %s504_s18 = smov [#allocation5]   ;;  %s505_s20 = smov [#allocation2]  }
   0x5   :  { %s33_s19 = sshll.u32 %s504_s18, 4  ;;  %s21_s21 = sshll.u32 %s505_s20, 4  ;;  %s34_s19 = int_to_ptr.vmem [resolvable:$true] %s33_s19  ;;  %s22_s21 = int_to_ptr.vmem [resolvable:$true] %s21_s21 }
   0x6   :  { %s382_s22 = scalar_lea.vmem %s34_s19, 384  ;;  %p387_p1 = scmp.lt.s32.totalorder %s34_s19, %s34_s19 }
   0x7   :  { %p383_p0 = scmp.ne.s32.totalorder %s34_s19, %s382_s22  ;;  %p388_p2 = scmp.lt.s32.totalorder %s382_s22, %s382_s22 }
   0x9   :  { %p389_p3 = por %p388_p2, %p387_p1 }
   0xb   :  { %p390_p4 = pnand %p389_p3, %p383_p0 }
   0xd   :  { %393 = shalt.err (!%p390_p4)
}
   0xe   :  { %s506_s23 = smov 128   ;;  %s507_s24 = smov 8  }
   0xf   :  { %39 = dma.hbm_to_vmem [thread:$0]  %s593_s1, 384, %s34_s19, [#allocation6], %s506_s23, %s506_s23, %s507_s24  }
  0x10   :  { %s402_s27 = scalar_lea.vmem %s22_s21, 384  ;;  %p407_p6 = scmp.lt.s32.totalorder %s22_s21, %s22_s21 }
  0x11   :  { %p403_p5 = scmp.ne.s32.totalorder %s22_s21, %s402_s27  ;;  %p408_p7 = scmp.lt.s32.totalorder %s402_s27, %s402_s27 }
  0x13   :  { %p409_p8 = por %p408_p7, %p407_p6 }
  0x15   :  { %p410_p9 = pnand %p409_p8, %p403_p5 }
  0x17   :  { %413 = shalt.err (!%p410_p9)
}
  0x18   :  { %27 = dma.hbm_to_vmem [thread:$0]  %s592_s0, 384, %s22_s21, [#allocation3], %s506_s23, %s506_s23, %s507_s24  }
  0x19   :  { %s508_s30 = smov [#allocation7]   ;;  %s509_s7 = smov [#allocation8]  }
  0x1a   :  { %s45_s6 = sshll.u32 %s508_s30, 4  ;;  %s57_s8 = sshll.u32 %s509_s7, 4  ;;  %s46_s6 = int_to_ptr.vmem [resolvable:$true] %s45_s6  ;;  %s58_s8 = int_to_ptr.vmem [resolvable:$true] %s57_s8 }
  0x1b   :  { %s422_s1 = scalar_lea.vmem %s46_s6, 512  ;;  %p427_p11 = scmp.lt.s32.totalorder %s46_s6, %s46_s6 }
  0x1c   :  { %p423_p10 = scmp.ne.s32.totalorder %s46_s6, %s422_s1  ;;  %p428_p12 = scmp.lt.s32.totalorder %s422_s1, %s422_s1 }
  0x1e   :  { %p429_p13 = por %p428_p12, %p427_p11 }
  0x20   :  { %p430_p0 = pnand %p429_p13, %p423_p10 }
  0x22   :  { %433 = shalt.err (!%p430_p0)
}
  0x23   :  { %51 = dma.hbm_to_vmem [thread:$0]  %s594_s2, 512, %s46_s6, [#allocation6], %s506_s23, %s506_s23, %s507_s24  }
  0x24   :  { %s442_s0 = scalar_lea.vmem %s58_s8, 512  ;;  %p447_p2 = scmp.lt.s32.totalorder %s58_s8, %s58_s8 }
  0x25   :  { %p443_p1 = scmp.ne.s32.totalorder %s58_s8, %s442_s0  ;;  %p448_p3 = scmp.lt.s32.totalorder %s442_s0, %s442_s0 }
  0x27   :  { %p449_p4 = por %p448_p3, %p447_p2 }
  0x29   :  { %p450_p5 = pnand %p449_p4, %p443_p1 }
  0x2b   :  { %453 = shalt.err (!%p450_p5)
}
  0x2c   :  { %63 = dma.hbm_to_vmem [thread:$0]  %s595_s3, 512, %s58_s8, [#allocation9], %s506_s23, %s506_s23, %s507_s24  }
  0x2d   :  { %494 = dma.done.wait [#allocation3], 384  }
  0x2e   :  { %495 = vsyncadd [#allocation3], 4294966912 }
  0x2f   :  { %496 = dma.done.wait [#allocation6], 896  }
  0x30   :  { %497 = vsyncadd [#allocation6], 4294966400 }
  0x31   :  { %498 = dma.done.wait [#allocation9], 512  }
  0x32   :  { %499 = vsyncadd [#allocation9], 4294966784  ;;  %v510_v0 = vmov 0.0   ;;  %vm511_vm0 = vmmov 0   ;;  %v82_v1 = vld [vmem:[#allocation7 + $0x18] sm:$0xff]  ;;  %v81_v3 = vld [vmem:[#allocation7 + $0x10] sm:$0xff] }
  0x33   :  { %330 = vmatprep.subr.mxu0 %v510_v0  ;;  %347 = vmatprep.subr.mxu1 %v510_v0  ;;  %v182_v2 = vld [vmem:[#allocation8 + $0x18] sm:$0xff]  ;;  %v181_v4 = vld [vmem:[#allocation8 + $0x10] sm:$0xff]  ;;  %v80_v5 = vld [vmem:[#allocation7 + $0x8] sm:$0xff]  ;;  %vm83_vm1 = vcmask 261120   ;;  %s512_s2 = smov [#allocation10]   ;;  %s513_s13 = smov [#allocation11]  }
  0x34   :  { %338 = vmatprep.mubr.msk.f32.mxu0 %vm511_vm0, %v510_v0  ;;  %355 = vmatprep.mubr.msk.f32.mxu1 %vm511_vm0, %v510_v0  ;;  %v180_v6 = vld [vmem:[#allocation8 + $0x8] sm:$0xff]  ;;  %v79_v7 = vld [vmem:[#allocation7] sm:$0xff]  ;;  %v76_v9 = vld [vmem:[#allocation2] sm:$0xff]  ;;  %s280_s3 = sshll.u32 %s512_s2, 4  ;;  %s292_s14 = sshll.u32 %s513_s13, 4  ;;  %s281_s3 = int_to_ptr.vmem [resolvable:$true] %s280_s3  ;;  %s293_s14 = int_to_ptr.vmem [resolvable:$true] %s292_s14 }
  0x35   :  { %331 = vmatpush3.msra.mxu0 %v82_v1  ;;  %348 = vmatpush3.msra.mxu1 %v182_v2  ;;  %v179_v8 = vld [vmem:[#allocation8] sm:$0xff]  ;;  %v176_v10 = vld [vmem:[#allocation5] sm:$0xff]  ;;  %v77_v11 = vld [vmem:[#allocation2 + $0x8] sm:$0xff]  ;;  %s454_s15 = scalar_lea.vmem %s281_s3, 384  ;;  %p459_p7 = scmp.lt.s32.totalorder %s281_s3, %s281_s3 }
  0x36   :  { %332 = vmatprep.subr.mxu0 %v510_v0  ;;  %349 = vmatprep.subr.mxu1 %v510_v0  ;;  %v177_v12 = vld [vmem:[#allocation5 + $0x8] sm:$0xff]  ;;  %v78_v13 = vld [vmem:[#allocation2 + $0x10] sm:$0xff]  ;;  %v178_v14 = vld [vmem:[#allocation5 + $0x10] sm:$0xff]  ;;  %p455_p6 = scmp.ne.s32.totalorder %s281_s3, %s454_s15  ;;  %p460_p8 = scmp.lt.s32.totalorder %s454_s15, %s454_s15 }
  0x37   :  { %333 = vmatpush3.msra.mxu0 %v81_v3  ;;  %350 = vmatpush3.msra.mxu1 %v181_v4 }
  0x38   :  { %334 = vmatprep.subr.mxu0 %v510_v0  ;;  %351 = vmatprep.subr.mxu1 %v510_v0  ;;  %p461_p9 = por %p460_p8, %p459_p7 }
  0x39   :  { %335 = vmatpush3.msra.mxu0 %v80_v5  ;;  %352 = vmatpush3.msra.mxu1 %v180_v6 }
  0x3a   :  { %336 = vmatprep.subr.mxu0 %v510_v0  ;;  %353 = vmatprep.subr.mxu1 %v510_v0  ;;  %p462_p10 = pnand %p461_p9, %p455_p6 }
  0x3b   :  { %337 = vmatpush3.msra.mxu0 %v79_v7  ;;  %354 = vmatpush3.msra.mxu1 %v179_v8 }
  0x3c   :  { %339 = vmatmul.mubr.msk.f32.vlgmr.msra.gmra.mxu0 %vm83_vm1, %v76_v9  ;;  %356 = vmatmul.mubr.msk.f32.vlgmr.msra.gmra.mxu1 %vm83_vm1, %v176_v10 }
  0x3d   :  { %341 = vmatprep.mubr.msk.f32.mxu0 %vm511_vm0, %v510_v0  ;;  %358 = vmatprep.mubr.msk.f32.mxu1 %vm511_vm0, %v510_v0 }
  0x40   :  { %342 = vmatmul.mubr.msk.f32.gmra.mxu0 %vm83_vm1, %v77_v11  ;;  %359 = vmatmul.mubr.msk.f32.gmra.mxu1 %vm83_vm1, %v177_v12 }
  0x41   :  { %344 = vmatprep.mubr.msk.f32.mxu0 %vm511_vm0, %v510_v0  ;;  %361 = vmatprep.mubr.msk.f32.mxu1 %vm511_vm0, %v510_v0 }
  0x44   :  { %345 = vmatmul.mubr.msk.f32.gmra.mxu0 %vm83_vm1, %v78_v13  ;;  %362 = vmatmul.mubr.msk.f32.gmra.mxu1 %vm83_vm1, %v178_v14 }
  0xfc   :  { %v159_v15 = vpop.f32.mrf.mxu0  ;;  %v258_v16 = vpop.f32.mrf.mxu1 }
  0xfd   :  { %173 = vst [vmem:[#allocation10] sm:$0xff] %v159_v15  ;;  %272 = vst [vmem:[#allocation11] sm:$0xff] %v258_v16 }
  0xfe   :  { %v340_v17 = vpop.f32.mrf.mxu0  ;;  %v357_v18 = vpop.f32.mrf.mxu1 }
 0x100   :  { %v164_v19 = vpop.f32.mrf.mxu0  ;;  %v263_v20 = vpop.f32.mrf.mxu1 }
 0x101   :  { %174 = vst [vmem:[#allocation10 + $0x8] sm:$0xff] %v164_v19  ;;  %273 = vst [vmem:[#allocation11 + $0x8] sm:$0xff] %v263_v20 }
 0x102   :  { %v343_v21 = vpop.f32.mrf.mxu0  ;;  %v360_v22 = vpop.f32.mrf.mxu1 }
 0x104   :  { %v169_v23 = vpop.f32.mrf.mxu0  ;;  %v268_v24 = vpop.f32.mrf.mxu1 }
 0x105   :  { %175 = vst [vmem:[#allocation10 + $0x10] sm:$0xff] %v169_v23  ;;  %274 = vst [vmem:[#allocation11 + $0x10] sm:$0xff] %v268_v24 }
 0x106   :  { %v346_v25 = vpop.f32.mrf.mxu0  ;;  %v363_v26 = vpop.f32.mrf.mxu1 }
 0x107   :  { %465 = shalt.err (!%p462_p10)
}
 0x108   :  { %286 = dma.vmem_to_hbm [thread:$0]  %s281_s3, 384, %s596_s4, [#allocation4], %s506_s23, %s506_s23, %s507_s24  }
 0x109   :  { %s474_s18 = scalar_lea.vmem %s293_s14, 384  ;;  %p479_p12 = scmp.lt.s32.totalorder %s293_s14, %s293_s14 }
 0x10a   :  { %p475_p11 = scmp.ne.s32.totalorder %s293_s14, %s474_s18  ;;  %p480_p13 = scmp.lt.s32.totalorder %s474_s18, %s474_s18 }
 0x10c   :  { %p481_p0 = por %p480_p13, %p479_p12 }
 0x10e   :  { %p482_p1 = pnand %p481_p0, %p475_p11 }
 0x110   :  { %485 = shalt.err (!%p482_p1)
}
 0x111   :  { %298 = dma.vmem_to_hbm [thread:$0]  %s293_s14, 384, %s597_s5, [#allocation12], %s506_s23, %s506_s23, %s507_s24  }
 0x112   :  { %500 = dma.done.wait [#allocation4], 384  }
 0x113   :  { %501 = vsyncadd [#allocation4], 4294966912 }
 0x114   :  { %502 = dma.done.wait [#allocation12], 384  }
 0x115   :  { %503 = vsyncadd [#allocation12], 4294966912 }
 0x116   :  { %305 = vsyncpa [#allocation3], 1 }
 0x117   :  { %306 = vsyncpa [#allocation6], 1 }
 0x118   :  { %307 = vsyncpa [#allocation9], 1 }
 0x119   :  { %308 = vsyncpa [#allocation4], 1 }
 0x11a   :  { %309 = vsyncpa [#allocation12], 1 }

</bundles_post_ra>
